<compile_context>
chip_gen: v5e
topology: v5e:2x2
jax: 0.10.0
libtpu: 0.0.40
codegen_flags: <defaults>
</compile_context>

<pallas_src>
import functools
import math

import jax
import jax.numpy as jnp
from jax.experimental import pallas as pl
from jax.experimental.pallas import tpu as pltpu


def _round_up(x, m):
    return ((x + m - 1) // m) * m


_DEFAULT_SCOPED_VMEM = 32 * 1024 * 1024


def _vmem_limit(estimate_bytes):
    """Return a vmem_limit_bytes value only if we need more than the default.

    Capped at 64 MiB so the same config stays legal on v7x (64 MiB physical).
    """
    if estimate_bytes <= _DEFAULT_SCOPED_VMEM:
        return None
    return int(min(estimate_bytes * 5 // 4, 64 * 1024 * 1024))


# ----------------------------------------------------------------------------
# Kernel 1: support = dropout(x) @ W   (weight resident, full-K per row block)
# ----------------------------------------------------------------------------
def _support_kernel(seed_ref, x_ref, w_ref, o_ref, *,
                    p, training, row_block, din, compute_dtype):
    x = x_ref[...]

    if training and p > 0.0:
        # Keep-mask from a hash of the global element index: independent of the
        # tiling, computed once per element (no per-j or per-k recomputation).
        i = pl.program_id(0)
        rows = jax.lax.broadcasted_iota(jnp.int32, x.shape, 0).astype(jnp.uint32)
        cols = jax.lax.broadcasted_iota(jnp.int32, x.shape, 1).astype(jnp.uint32)
        row_off = (i * row_block).astype(jnp.uint32)
        idx = (rows + row_off) * jnp.uint32(din) + cols

        z = idx ^ seed_ref[0].astype(jnp.uint32)
        z = z * jnp.uint32(0x9E3779B1)
        z = z ^ (z >> 15)
        z = z * jnp.uint32(0x85EBCA77)
        z = z ^ (z >> 13)
        z = z * jnp.uint32(0xC2B2AE3D)
        z = z ^ (z >> 16)

        # Integer-domain keep test: keep with probability (1 - p).
        thresh = min(int(round(p * 4294967296.0)), 4294967295)
        keep = z >= jnp.uint32(thresh)
        x = jnp.where(keep, x * jnp.float32(1.0 / (1.0 - p)), jnp.float32(0.0))

    o_ref[...] = jnp.dot(
        x.astype(compute_dtype),
        w_ref[...].astype(compute_dtype),
        preferred_element_type=jnp.float32,
    ).astype(o_ref.dtype)


def gcn_support_matmul(x, w, *, dropout_p=0.0, training=False, seed=0,
                       block_rows=256, compute_dtype=jnp.bfloat16):
    M, Din = x.shape
    Din2, Dout = w.shape
    assert Din == Din2, "inner dims must match"
    assert 0.0 <= float(dropout_p) < 1.0

    tm = min(block_rows, _round_up(M, 8))
    Mp = _round_up(M, tm)
    xp = jnp.pad(x, ((0, Mp - M), (0, 0))) if Mp != M else x

    seed_arr = jnp.asarray([int(seed)], dtype=jnp.int32)
    kernel = functools.partial(
        _support_kernel, p=float(dropout_p), training=bool(training),
        row_block=tm, din=Din, compute_dtype=compute_dtype)

    est = 4 * (2 * tm * Din + 2 * Din * Dout + 2 * tm * Dout) + (1 << 20)

    out = pl.pallas_call(
        kernel,
        out_shape=jax.ShapeDtypeStruct((Mp, Dout), jnp.float32),
        grid_spec=pltpu.PrefetchScalarGridSpec(
            num_scalar_prefetch=1,
            grid=(Mp // tm,),
            in_specs=[
                pl.BlockSpec((tm, Din), lambda i, seed: (i, 0)),
                pl.BlockSpec((Din, Dout), lambda i, seed: (0, 0)),  # resident W
            ],
            out_specs=pl.BlockSpec((tm, Dout), lambda i, seed: (i, 0)),
        ),
        compiler_params=pltpu.CompilerParams(
            dimension_semantics=("parallel",),
            vmem_limit_bytes=_vmem_limit(est)),
    )(seed_arr, xp, w)

    return out[:M] if Mp != M else out


# ----------------------------------------------------------------------------
# Kernel 2: out = adj @ support + bias   (support resident, accumulate in o_ref)
# ----------------------------------------------------------------------------
def _aggregate_kernel(adj_ref, sup_ref, bias_ref, o_ref, *, tk, compute_dtype):
    k = pl.program_id(1)

    @pl.when(k == 0)
    def _init():
        o_ref[...] = jnp.zeros_like(o_ref)

    # support is fully resident; slice the k-th row block for this adj tile.
    s = sup_ref[pl.ds(k * tk, tk), :]
    o_ref[...] += jnp.dot(
        adj_ref[...].astype(compute_dtype),
        s.astype(compute_dtype),
        preferred_element_type=jnp.float32,
    )

    @pl.when(k == pl.num_programs(1) - 1)
    def _finalize():
        o_ref[...] = o_ref[...] + bias_ref[...]   # fused bias (zeros if no bias)


def gcn_aggregate_matmul(adj, support, bias=None, *, block_rows=256,
                         block_k=512, compute_dtype=jnp.bfloat16):
    N, K = adj.shape
    K2, Dout = support.shape
    assert K == K2, "inner dims must match"

    tm = min(block_rows, _round_up(N, 8))
    tk = min(block_k, _round_up(K, 128))
    Np = _round_up(N, tm)
    Kp = _round_up(K, tk)

    adj_p = jnp.pad(adj, ((0, Np - N), (0, Kp - K))) if (Np != N or Kp != K) else adj
    sup_p = jnp.pad(support, ((0, Kp - K), (0, 0))) if Kp != K else support

    bias_arr = (bias if bias is not None
                else jnp.zeros((Dout,), jnp.float32)).reshape(1, Dout).astype(jnp.float32)

    kernel = functools.partial(_aggregate_kernel, tk=tk, compute_dtype=compute_dtype)

    est = 4 * (2 * tm * tk + 2 * Kp * Dout + 2 * tm * Dout + Dout) + (1 << 20)

    out = pl.pallas_call(
        kernel,
        out_shape=jax.ShapeDtypeStruct((Np, Dout), jnp.float32),
        grid_spec=pltpu.PrefetchScalarGridSpec(
            num_scalar_prefetch=0,
            grid=(Np // tm, Kp // tk),
            in_specs=[
                pl.BlockSpec((tm, tk), lambda i, k: (i, k)),
                pl.BlockSpec((Kp, Dout), lambda i, k: (0, 0)),  # resident support
                pl.BlockSpec((1, Dout), lambda i, k: (0, 0)),   # bias
            ],
            out_specs=pl.BlockSpec((tm, Dout), lambda i, k: (i, 0)),
        ),
        compiler_params=pltpu.CompilerParams(
            dimension_semantics=("parallel", "arbitrary"),
            vmem_limit_bytes=_vmem_limit(est)),
    )(adj_p, sup_p, bias_arr)

    return out[:N] if Np != N else out


# ----------------------------------------------------------------------------
# Module wrapper (mirrors the PyTorch GraphConvolution)
# ----------------------------------------------------------------------------
class GraphConvolutionPallas:
    def __init__(self, input_dim, output_dim, dropout, bias=False, *,
                 key=None, compute_dtype=jnp.bfloat16):
        if key is None:
            key = jax.random.PRNGKey(0)
        self.input_dim = input_dim
        self.output_dim = output_dim
        self.dropout = float(dropout)
        self.compute_dtype = compute_dtype
        # xavier_uniform_: U(-a, a), a = sqrt(6 / (fan_in + fan_out))
        bound = math.sqrt(6.0 / (input_dim + output_dim))
        self.weight = jax.random.uniform(
            key, (input_dim, output_dim), jnp.float32, -bound, bound)
        self.bias = jnp.zeros((output_dim,), jnp.float32) if bias else None

    def __call__(self, x, adj, *, training=False, seed=0):
        support = gcn_support_matmul(
            x, self.weight, dropout_p=self.dropout, training=training,
            seed=seed, compute_dtype=self.compute_dtype)
        out = gcn_aggregate_matmul(
            adj, support, self.bias, compute_dtype=self.compute_dtype)
        return out


if __name__ == "__main__":
    # Small, deliberately non-tile-aligned shapes to exercise the padding path.
    N, DIN, DOUT = 250, 96, 64

    key = jax.random.PRNGKey(0)
    k_x, k_adj, k_w, k_b = jax.random.split(key, 4)

    x = jax.random.normal(k_x, (N, DIN), jnp.float32)

    # Deterministic sparse-ish, row-normalized adjacency (dense storage).
    raw = jax.random.uniform(k_adj, (N, N), jnp.float32)
    adj = (raw > 0.9).astype(jnp.float32) + jnp.eye(N, dtype=jnp.float32)
    adj = adj / jnp.sum(adj, axis=1, keepdims=True)

    layer = GraphConvolutionPallas(DIN, DOUT, dropout=0.5, bias=True, key=k_w)
    # Non-zero bias so the fused bias add is actually tested.
    layer.bias = 0.1 * jax.random.normal(k_b, (DOUT,), jnp.float32)

    # Eval mode (dropout = identity): check against a reference that uses the
    # same bf16 MXU input casts with f32 accumulation.
    out_eval = jax.block_until_ready(layer(x, adj, training=False))
    bf16 = jnp.bfloat16
    sup_ref = jnp.dot(x.astype(bf16), layer.weight.astype(bf16),
                      preferred_element_type=jnp.float32)
    ref = jnp.dot(adj.astype(bf16), sup_ref.astype(bf16),
                  preferred_element_type=jnp.float32) + layer.bias
    assert out_eval.shape == (N, DOUT)
    assert jnp.allclose(out_eval, ref, atol=2e-2, rtol=2e-2), float(
        jnp.max(jnp.abs(out_eval - ref)))

    # Training mode: exercises the in-kernel (hash-based) dropout path.
    out_train = jax.block_until_ready(layer(x, adj, training=True, seed=1234))
    assert out_train.shape == (N, DOUT)
    assert bool(jnp.isfinite(out_train).all())
    assert not bool(jnp.allclose(out_train, out_eval, atol=1e-3))

    print("KERNEL_OK")
</pallas_src>

<mosaic_0001>
module attributes {stable_mosaic.version = 11 : i64} {
  func.func @_support_kernel(%arg0: i32, %arg1: memref<1xi32, #tpu.memory_space<smem>>, %arg2: memref<256x96xf32, #tpu.memory_space<vmem>>, %arg3: memref<96x64xf32, #tpu.memory_space<vmem>>, %arg4: memref<256x64xf32, #tpu.memory_space<vmem>>) attributes {dimension_semantics = [#tpu.dimension_semantics<parallel>], iteration_bounds = array<i64: 1>, scalar_prefetch = 1 : i64, scratch_operands = 0 : i64, tpu.core_type = #tpu.core_type<tc>, window_params = [{transform_indices = @transform_0, window_bounds = array<i64: 256, 96>}, {pipeline_mode = #tpu.pipeline_mode<synchronous>, transform_indices = @transform_1, window_bounds = array<i64: 96, 64>}, {transform_indices = @transform_2, window_bounds = array<i64: 256, 64>}]} {
    %c0 = arith.constant 0 : index
    %c0_0 = arith.constant 0 : index
    %0 = vector.load %arg2[%c0, %c0_0] : memref<256x96xf32, #tpu.memory_space<vmem>>, vector<256x96xf32>
    %1 = arith.truncf %0 : vector<256x96xf32> to vector<256x96xbf16>
    %c0_1 = arith.constant 0 : index
    %c0_2 = arith.constant 0 : index
    %2 = vector.load %arg3[%c0_1, %c0_2] : memref<96x64xf32, #tpu.memory_space<vmem>>, vector<96x64xf32>
    %3 = arith.truncf %2 : vector<96x64xf32> to vector<96x64xbf16>
    %cst = arith.constant dense<0.000000e+00> : vector<256x64xf32>
    %4 = tpu.matmul %1, %3, %cst {dimension_numbers = #tpu.dot_dimension_numbers<[1], [0], [0], [1], [0, 0, 1, 1], [], []>} : vector<256x96xbf16>, vector<96x64xbf16>, vector<256x64xf32> -> vector<256x64xf32>
    %c0_3 = arith.constant 0 : index
    %c0_4 = arith.constant 0 : index
    %5 = vector.load %arg4[%c0_3, %c0_4] : memref<256x64xf32, #tpu.memory_space<vmem>>, vector<256x64xf32>
    tpu.vector_store %arg4[%c0_3, %c0_4], %4 {strides = array<i32>} : memref<256x64xf32, #tpu.memory_space<vmem>>, vector<256x64xf32>,
    return
  }
  func.func @transform_0(%arg0: i32, %arg1: memref<1xi32, #tpu.memory_space<smem>>) -> (i32, i32) {
    %c0_i32 = arith.constant 0 : i32
    %c0_i32_0 = arith.constant 0 : i32
    return %arg0, %c0_i32 : i32, i32
  }
  func.func @transform_1(%arg0: i32, %arg1: memref<1xi32, #tpu.memory_space<smem>>) -> (i32, i32) {
    %c0_i32 = arith.constant 0 : i32
    %c0_i32_0 = arith.constant 0 : i32
    %c0_i32_1 = arith.constant 0 : i32
    return %c0_i32, %c0_i32_0 : i32, i32
  }
  func.func @transform_2(%arg0: i32, %arg1: memref<1xi32, #tpu.memory_space<smem>>) -> (i32, i32) {
    %c0_i32 = arith.constant 0 : i32
    %c0_i32_0 = arith.constant 0 : i32
    return %arg0, %c0_i32 : i32, i32
  }
}

</mosaic_0001>

<bundles_post_ra>
// kernel: tpu_custom_call.1
= control target key start
LH: loop header
LB: loop body
LE: loop exit
PB: predicated region body
PF: predicated region fallthrough
CT: control target
= control target key end

     0   :  { %vm80_vm0 = vcmask 785408   ;;  %vm218_vm1 = vcmask 523264   ;;  %s585_s0 = inlined_call_operand.<no memory space> [shape: s32[1], index: 0, kind: input, shape index: {}]   ;;  %s586_s2 = inlined_call_operand.vmem [shape: f32[96,64], index: 2, kind: input, shape index: {}]   ;;  %s587_s1 = inlined_call_operand.vmem [shape: f32[256,96], index: 1, kind: input, shape index: {}]   ;;  %s588_s3 = inlined_call_operand.vmem [shape: f32[256,64], index: 3, kind: output, shape index: {}]  }
   0x1   :  { %v72_v0 = vld [vmem:[%s586_s2 + $0x50] sm:$0xff]  ;;  %v73_v1 = vld [vmem:[%s586_s2 + $0x58] sm:$0xff]  ;;  %v70_v2 = vld [vmem:[%s586_s2 + $0x40] sm:$0xff] }
   0x2   :  { %v79_v3 = vpack.c.bf16 %v73_v1, %v72_v0  ;;  %v71_v4 = vld [vmem:[%s586_s2 + $0x48] sm:$0xff]  ;;  %v68_v6 = vld [vmem:[%s586_s2 + $0x30] sm:$0xff]  ;;  %v69_v7 = vld [vmem:[%s586_s2 + $0x38] sm:$0xff] }
   0x3   :  { %v78_v5 = vpack.c.bf16 %v71_v4, %v70_v2  ;;  %v77_v8 = vpack.c.bf16 %v69_v7, %v68_v6  ;;  %v66_v9 = vld [vmem:[%s586_s2 + $0x20] sm:$0xff]  ;;  %v67_v10 = vld [vmem:[%s586_s2 + $0x28] sm:$0xff]  ;;  %v64_v12 = vld [vmem:[%s586_s2 + $0x10] sm:$0xff] }
   0x4   :  { %131 = vmatpush.bf16.msra.mxu0 %v79_v3  ;;  %271 = vmatpush.bf16.msra.mxu1 %v79_v3  ;;  %v76_v11 = vpack.c.bf16 %v67_v10, %v66_v9  ;;  %v65_v13 = vld [vmem:[%s586_s2 + $0x18] sm:$0xff]  ;;  %v62_v15 = vld [vmem:[%s586_s2] sm:$0xff]  ;;  %v63_v16 = vld [vmem:[%s586_s2 + $0x8] sm:$0xff] }
   0x5   :  { %272 = vmatpush.bf16.msra.mxu2 %v79_v3  ;;  %273 = vmatpush.bf16.msra.mxu3 %v79_v3  ;;  %v75_v14 = vpack.c.bf16 %v65_v13, %v64_v12  ;;  %v14_v17 = vld [vmem:[%s587_s1] sm:$0xff]  ;;  %v15_v18 = vld [vmem:[%s587_s1 + $0x8] sm:$0xff]  ;;  %v74_v19 = vpack.c.bf16 %v63_v16, %v62_v15  ;;  %v16_v30 = vld [vmem:[%s587_s1 + $0x10] sm:$0xff] }
   0x6   :  { %v22_v20 = vld [vmem:[%s587_s1 + $0x40] sm:$0xff]  ;;  %v23_v21 = vld [vmem:[%s587_s1 + $0x48] sm:$0xff]  ;;  %v46_v26 = vpack.c.bf16 %v15_v18, %v14_v17  ;;  %v17_v31 = vld [vmem:[%s587_s1 + $0x18] sm:$0xff] }
   0x7   :  { %v30_v22 = vld [vmem:[%s587_s1 + $0x80] sm:$0xff]  ;;  %v31_v23 = vld [vmem:[%s587_s1 + $0x88] sm:$0xff]  ;;  %v50_v27 = vpack.c.bf16 %v23_v21, %v22_v20  ;;  %v24_v32 = vld [vmem:[%s587_s1 + $0x50] sm:$0xff]  ;;  %v47_v38 = vpack.c.bf16 %v17_v31, %v16_v30 }
   0x8   :  { %132 = vmatpush.bf16.msra.mxu0 %v78_v5  ;;  %274 = vmatpush.bf16.msra.mxu1 %v78_v5  ;;  %v38_v24 = vld [vmem:[%s587_s1 + $0xc0] sm:$0xff]  ;;  %v39_v25 = vld [vmem:[%s587_s1 + $0xc8] sm:$0xff]  ;;  %v54_v28 = vpack.c.bf16 %v31_v23, %v30_v22  ;;  %v25_v33 = vld [vmem:[%s587_s1 + $0x58] sm:$0xff] }
   0x9   :  { %275 = vmatpush.bf16.msra.mxu2 %v78_v5  ;;  %276 = vmatpush.bf16.msra.mxu3 %v78_v5  ;;  %v58_v29 = vpack.c.bf16 %v39_v25, %v38_v24  ;;  %v32_v34 = vld [vmem:[%s587_s1 + $0x90] sm:$0xff]  ;;  %v33_v35 = vld [vmem:[%s587_s1 + $0x98] sm:$0xff]  ;;  %v51_v39 = vpack.c.bf16 %v25_v33, %v24_v32  ;;  %v18_v42 = vld [vmem:[%s587_s1 + $0x20] sm:$0xff] }
   0xa   :  { %v40_v36 = vld [vmem:[%s587_s1 + $0xd0] sm:$0xff]  ;;  %v41_v37 = vld [vmem:[%s587_s1 + $0xd8] sm:$0xff]  ;;  %v55_v40 = vpack.c.bf16 %v33_v35, %v32_v34  ;;  %v19_v43 = vld [vmem:[%s587_s1 + $0x28] sm:$0xff] }
   0xb   :  { %v59_v41 = vpack.c.bf16 %v41_v37, %v40_v36  ;;  %v26_v44 = vld [vmem:[%s587_s1 + $0x60] sm:$0xff]  ;;  %v27_v45 = vld [vmem:[%s587_s1 + $0x68] sm:$0xff]  ;;  %v48_v50 = vpack.c.bf16 %v19_v43, %v18_v42  ;;  %v20_v54 = vld [vmem:[%s587_s1 + $0x30] sm:$0xff] }
   0xc   :  { %133 = vmatpush.bf16.msra.mxu0 %v77_v8  ;;  %277 = vmatpush.bf16.msra.mxu1 %v77_v8  ;;  %v34_v46 = vld [vmem:[%s587_s1 + $0xa0] sm:$0xff]  ;;  %v35_v47 = vld [vmem:[%s587_s1 + $0xa8] sm:$0xff]  ;;  %v52_v51 = vpack.c.bf16 %v27_v45, %v26_v44  ;;  %v21_v55 = vld [vmem:[%s587_s1 + $0x38] sm:$0xff] }
   0xd   :  { %278 = vmatpush.bf16.msra.mxu2 %v77_v8  ;;  %279 = vmatpush.bf16.msra.mxu3 %v77_v8  ;;  %v42_v48 = vld [vmem:[%s587_s1 + $0xe0] sm:$0xff]  ;;  %v43_v49 = vld [vmem:[%s587_s1 + $0xe8] sm:$0xff]  ;;  %v56_v52 = vpack.c.bf16 %v35_v47, %v34_v46  ;;  %v28_v56 = vld [vmem:[%s587_s1 + $0x70] sm:$0xff]  ;;  %v49_v62 = vpack.c.bf16 %v21_v55, %v20_v54 }
   0xe   :  { %v60_v53 = vpack.c.bf16 %v43_v49, %v42_v48  ;;  %v29_v57 = vld [vmem:[%s587_s1 + $0x78] sm:$0xff]  ;;  %v36_v58 = vld [vmem:[%s587_s1 + $0xb0] sm:$0xff] }
   0xf   :  { %v37_v59 = vld [vmem:[%s587_s1 + $0xb8] sm:$0xff]  ;;  %v44_v60 = vld [vmem:[%s587_s1 + $0xf0] sm:$0xff]  ;;  %v53_v63 = vpack.c.bf16 %v29_v57, %v28_v56 }
  0x10   :  { %134 = vmatpush.bf16.msra.mxu0 %v76_v11  ;;  %280 = vmatpush.bf16.msra.mxu1 %v76_v11  ;;  %v45_v61 = vld [vmem:[%s587_s1 + $0xf8] sm:$0xff]  ;;  %v57_v0 = vpack.c.bf16 %v37_v59, %v36_v58 }
  0x11   :  { %281 = vmatpush.bf16.msra.mxu2 %v76_v11  ;;  %282 = vmatpush.bf16.msra.mxu3 %v76_v11  ;;  %v61_v1 = vpack.c.bf16 %v45_v61, %v44_v60 }
  0x14   :  { %135 = vmatpush.bf16.msra.mxu0 %v75_v14  ;;  %283 = vmatpush.bf16.msra.mxu1 %v75_v14 }
  0x15   :  { %284 = vmatpush.bf16.msra.mxu2 %v75_v14  ;;  %285 = vmatpush.bf16.msra.mxu3 %v75_v14 }
  0x18   :  { %136 = vmatpush.bf16.msra.mxu0 %v74_v19  ;;  %286 = vmatpush.bf16.msra.mxu1 %v74_v19 }
  0x19   :  { %287 = vmatpush.bf16.msra.mxu2 %v74_v19  ;;  %288 = vmatpush.bf16.msra.mxu3 %v74_v19 }
  0x1b   :  { %255 = vmatmul.msk.bf16.vlgmr.msra.gmra.mxu0 %vm80_vm0, %v46_v26  ;;  %259 = vmatmul.msk.bf16.vlgmr.msra.gmra.mxu1 %vm80_vm0, %v50_v27 }
  0x1c   :  { %263 = vmatmul.msk.bf16.vlgmr.msra.gmra.mxu2 %vm80_vm0, %v54_v28  ;;  %267 = vmatmul.msk.bf16.vlgmr.msra.gmra.mxu3 %vm80_vm0, %v58_v29 }
  0x2b   :  { %256 = vmatmul.msk.bf16.gmra.mxu0 %vm80_vm0, %v47_v38  ;;  %260 = vmatmul.msk.bf16.gmra.mxu1 %vm80_vm0, %v51_v39 }
  0x2c   :  { %264 = vmatmul.msk.bf16.gmra.mxu2 %vm80_vm0, %v55_v40  ;;  %268 = vmatmul.msk.bf16.gmra.mxu3 %vm80_vm0, %v59_v41 }
  0x3b   :  { %257 = vmatmul.msk.bf16.gmra.mxu0 %vm80_vm0, %v48_v50  ;;  %261 = vmatmul.msk.bf16.gmra.mxu1 %vm80_vm0, %v52_v51 }
  0x3c   :  { %265 = vmatmul.msk.bf16.gmra.mxu2 %vm80_vm0, %v56_v52  ;;  %269 = vmatmul.msk.bf16.gmra.mxu3 %vm80_vm0, %v60_v53 }
  0x4b   :  { %258 = vmatmul.msk.bf16.gmra.mxu0 %vm80_vm0, %v49_v62  ;;  %262 = vmatmul.msk.bf16.gmra.mxu1 %vm80_vm0, %v53_v63 }
  0x4c   :  { %266 = vmatmul.msk.bf16.gmra.mxu2 %vm80_vm0, %v57_v0  ;;  %270 = vmatmul.msk.bf16.gmra.mxu3 %vm80_vm0, %v61_v1 }
  0x98   :  { %v138_v2 = vpop.f32.mrf.mxu0  ;;  %v158_v3 = vpop.f32.mrf.mxu1 }
  0x99   :  { %219 = vst.msk [vmem:[%s588_s3] sm:$0xff] %vm218_vm1, %v138_v2 }
  0x9a   :  { %227 = vst.msk [vmem:[%s588_s3 + $0x40] sm:$0xff] %vm218_vm1, %v158_v3 }
  0x9f   :  { %v178_v4 = vpop.f32.mrf.mxu2  ;;  %v198_v5 = vpop.f32.mrf.mxu3 }
  0xa0   :  { %235 = vst.msk [vmem:[%s588_s3 + $0x80] sm:$0xff] %vm218_vm1, %v178_v4  ;;  %v140_v6 = vpop.f32.mrf.mxu0  ;;  %v160_v7 = vpop.f32.mrf.mxu1 }
  0xa1   :  { %243 = vst.msk [vmem:[%s588_s3 + $0xc0] sm:$0xff] %vm218_vm1, %v198_v5 }
  0xa2   :  { %220 = vst.msk [vmem:[%s588_s3 + $0x8] sm:$0xff] %vm218_vm1, %v140_v6 }
  0xa3   :  { %228 = vst.msk [vmem:[%s588_s3 + $0x48] sm:$0xff] %vm218_vm1, %v160_v7 }
  0xa7   :  { %v180_v8 = vpop.f32.mrf.mxu2  ;;  %v200_v9 = vpop.f32.mrf.mxu3 }
  0xa8   :  { %236 = vst.msk [vmem:[%s588_s3 + $0x88] sm:$0xff] %vm218_vm1, %v180_v8  ;;  %v143_v10 = vpop.f32.mrf.mxu0  ;;  %v163_v11 = vpop.f32.mrf.mxu1 }
  0xa9   :  { %244 = vst.msk [vmem:[%s588_s3 + $0xc8] sm:$0xff] %vm218_vm1, %v200_v9 }
  0xaa   :  { %221 = vst.msk [vmem:[%s588_s3 + $0x10] sm:$0xff] %vm218_vm1, %v143_v10 }
  0xab   :  { %229 = vst.msk [vmem:[%s588_s3 + $0x50] sm:$0xff] %vm218_vm1, %v163_v11 }
  0xaf   :  { %v183_v12 = vpop.f32.mrf.mxu2  ;;  %v203_v13 = vpop.f32.mrf.mxu3 }
  0xb0   :  { %237 = vst.msk [vmem:[%s588_s3 + $0x90] sm:$0xff] %vm218_vm1, %v183_v12  ;;  %v145_v14 = vpop.f32.mrf.mxu0  ;;  %v165_v15 = vpop.f32.mrf.mxu1 }
  0xb1   :  { %245 = vst.msk [vmem:[%s588_s3 + $0xd0] sm:$0xff] %vm218_vm1, %v203_v13 }
  0xb2   :  { %222 = vst.msk [vmem:[%s588_s3 + $0x18] sm:$0xff] %vm218_vm1, %v145_v14 }
  0xb3   :  { %230 = vst.msk [vmem:[%s588_s3 + $0x58] sm:$0xff] %vm218_vm1, %v165_v15 }
  0xb7   :  { %v185_v16 = vpop.f32.mrf.mxu2  ;;  %v205_v17 = vpop.f32.mrf.mxu3 }
  0xb8   :  { %238 = vst.msk [vmem:[%s588_s3 + $0x98] sm:$0xff] %vm218_vm1, %v185_v16  ;;  %v148_v18 = vpop.f32.mrf.mxu0  ;;  %v168_v19 = vpop.f32.mrf.mxu1 }
  0xb9   :  { %246 = vst.msk [vmem:[%s588_s3 + $0xd8] sm:$0xff] %vm218_vm1, %v205_v17 }
  0xba   :  { %223 = vst.msk [vmem:[%s588_s3 + $0x20] sm:$0xff] %vm218_vm1, %v148_v18 }
  0xbb   :  { %231 = vst.msk [vmem:[%s588_s3 + $0x60] sm:$0xff] %vm218_vm1, %v168_v19 }
  0xbf   :  { %v188_v20 = vpop.f32.mrf.mxu2  ;;  %v208_v21 = vpop.f32.mrf.mxu3 }
  0xc0   :  { %239 = vst.msk [vmem:[%s588_s3 + $0xa0] sm:$0xff] %vm218_vm1, %v188_v20  ;;  %v150_v22 = vpop.f32.mrf.mxu0  ;;  %v170_v23 = vpop.f32.mrf.mxu1 }
  0xc1   :  { %247 = vst.msk [vmem:[%s588_s3 + $0xe0] sm:$0xff] %vm218_vm1, %v208_v21 }
  0xc2   :  { %224 = vst.msk [vmem:[%s588_s3 + $0x28] sm:$0xff] %vm218_vm1, %v150_v22 }
  0xc3   :  { %232 = vst.msk [vmem:[%s588_s3 + $0x68] sm:$0xff] %vm218_vm1, %v170_v23 }
  0xc7   :  { %v190_v24 = vpop.f32.mrf.mxu2  ;;  %v210_v25 = vpop.f32.mrf.mxu3 }
  0xc8   :  { %240 = vst.msk [vmem:[%s588_s3 + $0xa8] sm:$0xff] %vm218_vm1, %v190_v24  ;;  %v153_v26 = vpop.f32.mrf.mxu0  ;;  %v173_v27 = vpop.f32.mrf.mxu1 }
  0xc9   :  { %248 = vst.msk [vmem:[%s588_s3 + $0xe8] sm:$0xff] %vm218_vm1, %v210_v25 }
  0xca   :  { %225 = vst.msk [vmem:[%s588_s3 + $0x30] sm:$0xff] %vm218_vm1, %v153_v26 }
  0xcb   :  { %233 = vst.msk [vmem:[%s588_s3 + $0x70] sm:$0xff] %vm218_vm1, %v173_v27 }
  0xcf   :  { %v193_v28 = vpop.f32.mrf.mxu2  ;;  %v213_v29 = vpop.f32.mrf.mxu3 }
  0xd0   :  { %241 = vst.msk [vmem:[%s588_s3 + $0xb0] sm:$0xff] %vm218_vm1, %v193_v28  ;;  %v155_v30 = vpop.f32.mrf.mxu0  ;;  %v175_v31 = vpop.f32.mrf.mxu1 }
  0xd1   :  { %249 = vst.msk [vmem:[%s588_s3 + $0xf0] sm:$0xff] %vm218_vm1, %v213_v29 }
  0xd2   :  { %226 = vst.msk [vmem:[%s588_s3 + $0x38] sm:$0xff] %vm218_vm1, %v155_v30 }
  0xd3   :  { %234 = vst.msk [vmem:[%s588_s3 + $0x78] sm:$0xff] %vm218_vm1, %v175_v31 }
  0xd7   :  { %v195_v32 = vpop.f32.mrf.mxu2  ;;  %v215_v33 = vpop.f32.mrf.mxu3 }
  0xd8   :  { %242 = vst.msk [vmem:[%s588_s3 + $0xb8] sm:$0xff] %vm218_vm1, %v195_v32 }
  0xd9   :  { %250 = vst.msk [vmem:[%s588_s3 + $0xf8] sm:$0xff] %vm218_vm1, %v215_v33 }

</bundles_post_ra>
